<compile_context>
chip_gen: v5e
topology: v5e:2x2
jax: 0.10.0
libtpu: 0.0.40
codegen_flags: <defaults>
</compile_context>

<pallas_src>
import functools

import jax
import jax.numpy as jnp
from jax import lax
from jax.experimental import pallas as pl
from jax.experimental.pallas import tpu as pltpu


def _round_up(x, m):
    return (x + m - 1) // m * m


def _onehot_gather(idx_ref, emb_ref, Vp):
    """Embedding row gather as a one-hot MXU matmul (vectorized)."""
    tm = idx_ref.shape[0]
    ids = idx_ref[...]                                       # (tm, 1) int32, VMEM
    lane = lax.broadcasted_iota(jnp.int32, (tm, Vp), 1)
    onehot = (lane == ids).astype(jnp.float32)               # (tm, Vp)
    # One-hot rows are exactly representable, so the multi-pass f32 MXU matmul
    # reproduces the table rows to ~f32 precision.
    return jnp.dot(onehot, emb_ref[...], preferred_element_type=jnp.float32)


def _bigram_logits_kernel(idx_ref, emb_ref, logits_ref, *, Vp):
    # Inference path: logits only, no cross-entropy work.
    logits_ref[...] = _onehot_gather(idx_ref, emb_ref, Vp)


def _bigram_loss_kernel(idx_ref, tgt_ref, emb_ref, logits_ref, nll_ref,
                        *, tm, V, Vp, N):
    logits = _onehot_gather(idx_ref, emb_ref, Vp)            # (tm, Vp) f32
    logits_ref[...] = logits

    lane = lax.broadcasted_iota(jnp.int32, (tm, Vp), 1)
    # Mask padded vocab lanes before max / logsumexp.
    masked = jnp.where(lane < V, logits, jnp.float32(-1e30))
    m = jnp.max(masked, axis=-1, keepdims=True)
    lse = m + jnp.log(jnp.sum(jnp.exp(masked - m), axis=-1, keepdims=True))

    tgt = tgt_ref[...]                                       # (tm, 1) int32, VMEM
    picked = jnp.sum(jnp.where(lane == tgt, logits, 0.0), axis=-1, keepdims=True)

    # Mask rows that are padding of the flattened (B*T) axis.
    row = pl.program_id(0) * tm + lax.broadcasted_iota(jnp.int32, (tm, 1), 0)
    valid = (row < N).astype(jnp.float32)
    nll_ref[...] = (lse - picked) * valid                    # per-row NLL partials


def bigram_forward(idx, emb_table, targets=None, *, tm=256):
    """Mirrors BigramLanguageModel.forward.

    Returns (logits, loss):
      - targets is None: logits shaped (B, T, V), loss is None.
      - targets given:   logits shaped (B*T, V) (as in the PyTorch .view), scalar loss.
    """
    B, T = idx.shape
    V = emb_table.shape[0]
    N = B * T

    Vp = _round_up(V, 128)                 # lane-dense vocab dim (and table rows)
    tm = min(tm, _round_up(N, 8))          # don't over-pad toy-sized inputs
    n_tiles = pl.cdiv(N, tm)
    N_pad = n_tiles * tm

    emb_p = jnp.pad(emb_table.astype(jnp.float32), ((0, Vp - V), (0, Vp - V)))
    idx_col = jnp.pad(idx.reshape(-1).astype(jnp.int32),
                      (0, N_pad - N)).reshape(N_pad, 1)

    # Resident-table VMEM budget: table + double-buffered id/tgt/logits/nll blocks.
    table_bytes = Vp * Vp * 4
    block_bytes = 2 * (3 * tm * 128 * 4 + tm * Vp * 4)
    vmem_limit = 32 * 1024 * 1024          # safe scoped limit on v5e/v6e/v7x
    assert table_bytes + block_bytes < vmem_limit, (
        "embedding table no longer fits VMEM-resident; needs the HBM-gather path")
    # TODO(synk): for vocabularies too large for a resident (Vp, Vp) f32 table
    # (notably v7x's 64 MiB VMEM), switch the table to memory_space=pl.ANY and
    # DMA vocab tiles per step instead of the resident one-hot matmul; on
    # v5e/v6e the vmem_limit can instead be raised toward 64-96 MiB.

    compiler_params = pltpu.CompilerParams(
        dimension_semantics=("parallel",),  # no cross-tile state -> megacore-friendly
        vmem_limit_bytes=vmem_limit,
    )

    if targets is None:
        logits_p = pl.pallas_call(
            functools.partial(_bigram_logits_kernel, Vp=Vp),
            out_shape=jax.ShapeDtypeStruct((N_pad, Vp), jnp.float32),
            grid=(n_tiles,),
            in_specs=[
                pl.BlockSpec((tm, 1), lambda i: (i, 0)),    # token ids (VMEM column)
                pl.BlockSpec((Vp, Vp), lambda i: (0, 0)),   # resident embedding table
            ],
            out_specs=pl.BlockSpec((tm, Vp), lambda i: (i, 0)),
            compiler_params=compiler_params,
            cost_estimate=pl.CostEstimate(
                flops=2 * N_pad * Vp * Vp,
                transcendentals=0,
                bytes_accessed=4 * (Vp * Vp + N_pad + N_pad * Vp),
            ),
        )(idx_col, emb_p)
        # TODO(synk): the [:N, :V] slice + reshape materializes a second copy of
        # the logits in XLA; callers that tolerate the padded layout can skip it.
        return logits_p[:N, :V].reshape(B, T, V), None

    tgt_col = jnp.pad(targets.reshape(-1).astype(jnp.int32),
                      (0, N_pad - N)).reshape(N_pad, 1)
    logits_p, nll = pl.pallas_call(
        functools.partial(_bigram_loss_kernel, tm=tm, V=V, Vp=Vp, N=N),
        out_shape=(
            jax.ShapeDtypeStruct((N_pad, Vp), jnp.float32),
            jax.ShapeDtypeStruct((N_pad, 1), jnp.float32),
        ),
        grid=(n_tiles,),
        in_specs=[
            pl.BlockSpec((tm, 1), lambda i: (i, 0)),        # token ids
            pl.BlockSpec((tm, 1), lambda i: (i, 0)),        # targets
            pl.BlockSpec((Vp, Vp), lambda i: (0, 0)),       # resident embedding table
        ],
        out_specs=(
            pl.BlockSpec((tm, Vp), lambda i: (i, 0)),       # logits
            pl.BlockSpec((tm, 1), lambda i: (i, 0)),        # per-row NLL partials
        ),
        compiler_params=compiler_params,
        cost_estimate=pl.CostEstimate(
            flops=2 * N_pad * Vp * Vp + 10 * N_pad * Vp,
            transcendentals=N_pad * Vp + N_pad,
            bytes_accessed=4 * (Vp * Vp + 2 * N_pad + N_pad * Vp + N_pad),
        ),
    )(idx_col, tgt_col, emb_p)

    loss = jnp.sum(nll) / N                # reduce per-row partials in the wrapper
    return logits_p[:N, :V], loss


def _reference(idx, emb_table, targets):
    B, T = idx.shape
    V = emb_table.shape[0]
    logits = emb_table[idx].reshape(B * T, V)
    ls = jax.nn.log_softmax(logits, axis=-1)
    loss = -jnp.mean(ls[jnp.arange(B * T), targets.reshape(-1)])
    return logits, loss


if __name__ == "__main__":
    key = jax.random.PRNGKey(0)
    vocab_size = 65          # Karpathy tiny-shakespeare char vocab size

    k1, k2, k3, k4, k5 = jax.random.split(key, 5)
    # Deterministic synthetic "nn.Embedding(vocab_size, vocab_size)" weight.
    emb_table = jax.random.normal(k1, (vocab_size, vocab_size), jnp.float32)

    # --- small case (B=2, T=8), both paths ------------------------------------
    B, T = 2, 8
    idx = jax.random.randint(k2, (B, T), 0, vocab_size, dtype=jnp.int32)
    targets = jax.random.randint(k3, (B, T), 0, vocab_size, dtype=jnp.int32)

    logits, loss = bigram_forward(idx, emb_table, targets)
    jax.block_until_ready((logits, loss))
    logits_bt, loss_none = bigram_forward(idx, emb_table, None)
    jax.block_until_ready(logits_bt)

    ref_logits, ref_loss = _reference(idx, emb_table, targets)
    assert logits.shape == (B * T, vocab_size)
    assert logits_bt.shape == (B, T, vocab_size)
    assert jnp.allclose(logits, ref_logits, atol=1e-4, rtol=1e-4)
    assert jnp.allclose(logits_bt.reshape(B * T, vocab_size), ref_logits,
                        atol=1e-4, rtol=1e-4)
    assert jnp.allclose(loss, ref_loss, atol=1e-4, rtol=1e-4)
    assert loss_none is None

    # --- larger case exercising multi-tile grid + row padding (N=300, tm=256) --
    B2, T2 = 3, 100
    idx2 = jax.random.randint(k4, (B2, T2), 0, vocab_size, dtype=jnp.int32)
    tgt2 = jax.random.randint(k5, (B2, T2), 0, vocab_size, dtype=jnp.int32)
    logits2, loss2 = bigram_forward(idx2, emb_table, tgt2)
    jax.block_until_ready((logits2, loss2))
    ref_logits2, ref_loss2 = _reference(idx2, emb_table, tgt2)
    assert logits2.shape == (B2 * T2, vocab_size)
    assert jnp.allclose(logits2, ref_logits2, atol=1e-4, rtol=1e-4)
    assert jnp.allclose(loss2, ref_loss2, atol=1e-4, rtol=1e-4)

    print("KERNEL_OK")
</pallas_src>

<mosaic_0001>
module attributes {stable_mosaic.version = 11 : i64} {
  func.func @_bigram_loss_kernel(%arg0: i32, %arg1: memref<16x1xi32, #tpu.memory_space<vmem>>, %arg2: memref<16x1xi32, #tpu.memory_space<vmem>>, %arg3: memref<128x128xf32, #tpu.memory_space<vmem>>, %arg4: memref<16x128xf32, #tpu.memory_space<vmem>>, %arg5: memref<16x1xf32, #tpu.memory_space<vmem>>) attributes {dimension_semantics = [#tpu.dimension_semantics<parallel>], iteration_bounds = array<i64: 1>, scalar_prefetch = 0 : i64, scratch_operands = 0 : i64, tpu.core_type = #tpu.core_type<tc>, window_params = [{transform_indices = @transform_0, window_bounds = array<i64: 16, 1>}, {transform_indices = @transform_1, window_bounds = array<i64: 16, 1>}, {pipeline_mode = #tpu.pipeline_mode<synchronous>, transform_indices = @transform_2, window_bounds = array<i64: 128, 128>}, {transform_indices = @transform_3, window_bounds = array<i64: 16, 128>}, {transform_indices = @transform_4, window_bounds = array<i64: 16, 1>}]} {
    %c0 = arith.constant 0 : index
    %c0_0 = arith.constant 0 : index
    %0 = vector.load %arg1[%c0, %c0_0] : memref<16x1xi32, #tpu.memory_space<vmem>>, vector<16x1xi32>
    %1 = tpu.iota {dimensions = array<i32: 1>} : vector<16x128xi32>
    %2 = vector.broadcast %0 : vector<16x1xi32> to vector<16x128xi32>
    %3 = arith.cmpi eq, %1, %2 : vector<16x128xi32>
    %4 = arith.extui %3 : vector<16x128xi1> to vector<16x128xi32>
    %5 = arith.sitofp %4 : vector<16x128xi32> to vector<16x128xf32>
    %c0_1 = arith.constant 0 : index
    %c0_2 = arith.constant 0 : index
    %6 = vector.load %arg3[%c0_1, %c0_2] : memref<128x128xf32, #tpu.memory_space<vmem>>, vector<128x128xf32>
    %cst = arith.constant dense<0.000000e+00> : vector<16x128xf32>
    %7 = tpu.matmul %5, %6, %cst {dimension_numbers = #tpu.dot_dimension_numbers<[1], [0], [0], [1], [0, 0, 1, 1], [], []>} : vector<16x128xf32>, vector<128x128xf32>, vector<16x128xf32> -> vector<16x128xf32>
    %c0_3 = arith.constant 0 : index
    %c0_4 = arith.constant 0 : index
    %8 = vector.load %arg4[%c0_3, %c0_4] : memref<16x128xf32, #tpu.memory_space<vmem>>, vector<16x128xf32>
    tpu.vector_store %arg4[%c0_3, %c0_4], %7 {strides = array<i32>} : memref<16x128xf32, #tpu.memory_space<vmem>>, vector<16x128xf32>,
    %9 = tpu.iota {dimensions = array<i32: 1>} : vector<16x128xi32>
    %c65_i32 = arith.constant 65 : i32
    %10 = vector.broadcast %c65_i32 : i32 to vector<16x128xi32>
    %11 = arith.cmpi slt, %9, %10 : vector<16x128xi32>
    %cst_5 = arith.constant -1.000000e+30 : f32
    %12 = vector.broadcast %cst_5 : f32 to vector<16x128xf32>
    %13 = arith.select %11, %7, %12 : vector<16x128xi1>, vector<16x128xf32>
    %cst_6 = arith.constant dense<0xFF800000> : vector<16xf32>
    %14 = vector.multi_reduction <maximumf>, %13, %cst_6 [1] : vector<16x128xf32> to vector<16xf32>
    %15 = vector.shape_cast %14 : vector<16xf32> to vector<16x1xf32>
    %16 = vector.broadcast %15 : vector<16x1xf32> to vector<16x128xf32>
    %17 = arith.subf %13, %16 : vector<16x128xf32>
    %18 = math.exp %17 : vector<16x128xf32>
    %cst_7 = arith.constant dense<0.000000e+00> : vector<16xf32>
    %19 = vector.multi_reduction <add>, %18, %cst_7 [1] : vector<16x128xf32> to vector<16xf32>
    %20 = vector.shape_cast %19 : vector<16xf32> to vector<16x1xf32>
    %21 = math.log %20 : vector<16x1xf32>
    %22 = arith.addf %15, %21 : vector<16x1xf32>
    %c0_8 = arith.constant 0 : index
    %c0_9 = arith.constant 0 : index
    %23 = vector.load %arg2[%c0_8, %c0_9] : memref<16x1xi32, #tpu.memory_space<vmem>>, vector<16x1xi32>
    %24 = vector.broadcast %23 : vector<16x1xi32> to vector<16x128xi32>
    %25 = arith.cmpi eq, %9, %24 : vector<16x128xi32>
    %cst_10 = arith.constant 0.000000e+00 : f32
    %26 = vector.broadcast %cst_10 : f32 to vector<16x128xf32>
    %27 = arith.select %25, %7, %26 : vector<16x128xi1>, vector<16x128xf32>
    %cst_11 = arith.constant dense<0.000000e+00> : vector<16xf32>
    %28 = vector.multi_reduction <add>, %27, %cst_11 [1] : vector<16x128xf32> to vector<16xf32>
    %29 = vector.shape_cast %28 : vector<16xf32> to vector<16x1xf32>
    %c16_i32 = arith.constant 16 : i32
    %30 = arith.muli %arg0, %c16_i32 : i32
    %31 = tpu.iota {dimensions = array<i32: 0>} : vector<16x1xi32>
    %32 = vector.broadcast %30 : i32 to vector<16x1xi32>
    %33 = arith.addi %32, %31 : vector<16x1xi32>
    %c16_i32_12 = arith.constant 16 : i32
    %34 = vector.broadcast %c16_i32_12 : i32 to vector<16x1xi32>
    %35 = arith.cmpi slt, %33, %34 : vector<16x1xi32>
    %36 = arith.extui %35 : vector<16x1xi1> to vector<16x1xi32>
    %37 = arith.sitofp %36 : vector<16x1xi32> to vector<16x1xf32>
    %38 = arith.subf %22, %29 : vector<16x1xf32>
    %39 = arith.mulf %38, %37 : vector<16x1xf32>
    %c0_13 = arith.constant 0 : index
    %c0_14 = arith.constant 0 : index
    %40 = vector.load %arg5[%c0_13, %c0_14] : memref<16x1xf32, #tpu.memory_space<vmem>>, vector<16x1xf32>
    tpu.vector_store %arg5[%c0_13, %c0_14], %39 {strides = array<i32>} : memref<16x1xf32, #tpu.memory_space<vmem>>, vector<16x1xf32>,
    return
  }
  func.func @transform_0(%arg0: i32) -> (i32, i32) {
    %c0_i32 = arith.constant 0 : i32
    %c0_i32_0 = arith.constant 0 : i32
    return %arg0, %c0_i32 : i32, i32
  }
  func.func @transform_1(%arg0: i32) -> (i32, i32) {
    %c0_i32 = arith.constant 0 : i32
    %c0_i32_0 = arith.constant 0 : i32
    return %arg0, %c0_i32 : i32, i32
  }
  func.func @transform_2(%arg0: i32) -> (i32, i32) {
    %c0_i32 = arith.constant 0 : i32
    %c0_i32_0 = arith.constant 0 : i32
    %c0_i32_1 = arith.constant 0 : i32
    return %c0_i32, %c0_i32_0 : i32, i32
  }
  func.func @transform_3(%arg0: i32) -> (i32, i32) {
    %c0_i32 = arith.constant 0 : i32
    %c0_i32_0 = arith.constant 0 : i32
    return %arg0, %c0_i32 : i32, i32
  }
  func.func @transform_4(%arg0: i32) -> (i32, i32) {
    %c0_i32 = arith.constant 0 : i32
    %c0_i32_0 = arith.constant 0 : i32
    return %arg0, %c0_i32 : i32, i32
  }
}

</mosaic_0001>

<bundles_post_ra>
// kernel: tpu_custom_call.1
= control target key start
LH: loop header
LB: loop body
LE: loop exit
PB: predicated region body
PF: predicated region fallthrough
CT: control target
= control target key end

     0   :  { %10 = vsyncpa [#allocation3], 0  ;;  %s321_s0 = inlined_call_operand.vmem [shape: s32[16,1], index: 0, kind: input, shape index: {}]   ;;  %s322_s1 = inlined_call_operand.vmem [shape: s32[16,1], index: 1, kind: input, shape index: {}]   ;;  %s323_s2 = inlined_call_operand.hbm [shape: f32[128,128], index: 2, kind: input, shape index: {}]   ;;  %s324_s3 = inlined_call_operand.hbm [shape: f32[16,128], index: 3, kind: output, shape index: {0}]   ;;  %s325_s4 = inlined_call_operand.vmem [shape: f32[16,1], index: 4, kind: output, shape index: {1}]  }
   0x1   :  { %11 = vsyncpa [#allocation4], 0  ;;  %s20_s17 = sshll.u32 %s323_s2, 4  ;;  %s260_s18 = smov [#allocation2]   ;;  %s21_s17 = int_to_ptr.hbm [resolvable:$true] %s20_s17 }
   0x2   :  { %s22_s19 = sshll.u32 %s260_s18, 4  ;;  %s261_s20 = smov 128   ;;  %s23_s19 = int_to_ptr.vmem [resolvable:$true] %s22_s19 }
   0x3   :  { %s262_s21 = smov 8  }
   0x4   :  { %28 = dma.hbm_to_vmem [thread:$0]  %s21_s17, 2048, %s23_s19, [#allocation3], %s261_s20, %s261_s20, %s262_s21  }
   0x5   :  { %256 = dma.done.wait [#allocation3], 2048  }
   0x6   :  { %257 = vsyncadd [#allocation3], 4294965248  ;;  %v263_v0 = vmov 0   ;;  %v33_v1 = vld [vmem:[%s321_s0] sm:$0xff]  ;;  %v64_v2 = vld [vmem:[#allocation2 + $0x78] sm:$0xff]  ;;  %v35_v21 = vlaneseq  ;;  %v264_v24 = vmov 1.0  }
   0x7   :  { %198 = vset.pattern.permute.xlu0 %v263_v0  ;;  %199 = vset.pattern.permute.xlu2 %v263_v0  ;;  %v63_v3 = vld [vmem:[#allocation2 + $0x70] sm:$0xff]  ;;  %v62_v4 = vld [vmem:[#allocation2 + $0x68] sm:$0xff]  ;;  %v61_v5 = vld [vmem:[#allocation2 + $0x60] sm:$0xff]  ;;  %s155_s5 = sshll.u32 %s324_s3, 4  ;;  %vm146_vm5 = vcmask 7168   ;;  %s156_s5 = int_to_ptr.hbm [resolvable:$true] %s155_s5 }
   0x8   :  { %38 = vperm.xlu0 %198, %v33_v1   ;;  %65 = vmatpush.msra.mxu0 %v64_v2  ;;  %v34_v6 = vld [vmem:[%s321_s0 + $0x8] sm:$0xff]  ;;  %v60_v7 = vld [vmem:[#allocation2 + $0x58] sm:$0xff]  ;;  %v59_v8 = vld [vmem:[#allocation2 + $0x50] sm:$0xff]  ;;  %v36_v22 = vand.u32 127, %v35_v21 }
   0x9   :  { %176 = vmatpush.msra.mxu1 %v64_v2  ;;  %v58_v9 = vld [vmem:[#allocation2 + $0x48] sm:$0xff]  ;;  %v57_v10 = vld [vmem:[#allocation2 + $0x40] sm:$0xff]  ;;  %v56_v11 = vld [vmem:[#allocation2 + $0x38] sm:$0xff] }
   0xa   :  { %66 = vmatpush.msra.mxu0 %v63_v3  ;;  %v55_v12 = vld [vmem:[#allocation2 + $0x30] sm:$0xff]  ;;  %v54_v13 = vld [vmem:[#allocation2 + $0x28] sm:$0xff]  ;;  %v53_v14 = vld [vmem:[#allocation2 + $0x20] sm:$0xff]  ;;  %vm90_vm3 = vcmp.lt.s32.totalorder %v36_v22, 65 }
   0xb   :  { %177 = vmatpush.msra.mxu1 %v63_v3  ;;  %v52_v15 = vld [vmem:[#allocation2 + $0x18] sm:$0xff]  ;;  %v51_v16 = vld [vmem:[#allocation2 + $0x10] sm:$0xff]  ;;  %v50_v17 = vld [vmem:[#allocation2 + $0x8] sm:$0xff] }
   0xc   :  { %67 = vmatpush.msra.mxu0 %v62_v4  ;;  %v49_v18 = vld [vmem:[#allocation2] sm:$0xff]  ;;  %v114_v20 = vld [vmem:[%s322_s1 + $0x8] sm:$0xff] }
   0xd   :  { %178 = vmatpush.msra.mxu1 %v62_v4  ;;  %v113_v19 = vld [vmem:[%s322_s1] sm:$0xff]  ;;  %s265_s1 = smov [#allocation5]  }
   0xe   :  { %68 = vmatpush.msra.mxu0 %v61_v5  ;;  %116 = vperm.xlu2 %199, %v113_v19   ;;  %s153_s28 = sshll.u32 %s265_s1, 4  ;;  %s154_s28 = int_to_ptr.vmem [resolvable:$true] %s153_s28 }
   0xf   :  { %179 = vmatpush.msra.mxu1 %v61_v5 }
  0x10   :  { %41 = vperm.xlu0 %198, %v34_v6   ;;  %69 = vmatpush.msra.mxu0 %v60_v7 }
  0x11   :  { %180 = vmatpush.msra.mxu1 %v60_v7 }
  0x12   :  { %70 = vmatpush.msra.mxu0 %v59_v8 }
  0x13   :  { %181 = vmatpush.msra.mxu1 %v59_v8 }
  0x14   :  { %71 = vmatpush.msra.mxu0 %v58_v9 }
  0x15   :  { %182 = vmatpush.msra.mxu1 %v58_v9 }
  0x16   :  { %72 = vmatpush.msra.mxu0 %v57_v10  ;;  %119 = vperm.xlu2 %199, %v114_v20  }
  0x17   :  { %183 = vmatpush.msra.mxu1 %v57_v10 }
  0x18   :  { %73 = vmatpush.msra.mxu0 %v56_v11 }
  0x19   :  { %184 = vmatpush.msra.mxu1 %v56_v11 }
  0x1a   :  { %74 = vmatpush.msra.mxu0 %v55_v12 }
  0x1b   :  { %185 = vmatpush.msra.mxu1 %v55_v12 }
  0x1c   :  { %75 = vmatpush.msra.mxu0 %v54_v13 }
  0x1d   :  { %186 = vmatpush.msra.mxu1 %v54_v13 }
  0x1e   :  { %76 = vmatpush.msra.mxu0 %v53_v14 }
  0x1f   :  { %187 = vmatpush.msra.mxu1 %v53_v14 }
  0x20   :  { %77 = vmatpush.msra.mxu0 %v52_v15 }
  0x21   :  { %188 = vmatpush.msra.mxu1 %v52_v15 }
  0x22   :  { %78 = vmatpush.msra.mxu0 %v51_v16 }
  0x23   :  { %189 = vmatpush.msra.mxu1 %v51_v16 }
  0x24   :  { %79 = vmatpush.msra.mxu0 %v50_v17 }
  0x25   :  { %190 = vmatpush.msra.mxu1 %v50_v17 }
  0x26   :  { %80 = vmatpush.msra.mxu0 %v49_v18 }
  0x27   :  { %191 = vmatpush.msra.mxu1 %v49_v18 }
  0x68   :  { %v117_v26 = vpop.permute.xlu2 %116 }
  0x69   :  { %vm121_vm2 = vcmp.eq.s32.totalorder %v36_v22, %v117_v26 }
  0x70   :  { %v120_v40 = vpop.permute.xlu2 %119 }
  0x71   :  { %vm122_vm4 = vcmp.eq.s32.totalorder %v36_v22, %v120_v40 }
  0x7a   :  { %v39_v23 = vpop.permute.xlu0 %38 }
  0x7b   :  { %vm43_vm0 = vcmp.eq.s32.totalorder %v36_v22, %v39_v23 }
  0x7c   :  { %174 = vmatmul.msk.f32.vlgmr.msra.gmra.mxu0 %vm43_vm0, %v264_v24 }
  0x82   :  { %v42_v25 = vpop.permute.xlu0 %41 }
  0x83   :  { %vm44_vm1 = vcmp.eq.s32.totalorder %v36_v22, %v42_v25 }
  0x84   :  { %175 = vmatmul.msk.f32.vlgmr.msra.gmra.mxu1 %vm44_vm1, %v264_v24 }
  0xf9   :  { %v82_v27 = vpop.f32.mrf.mxu0 }
  0xfa   :  { %88 = vst [vmem:[#allocation5] sm:$0xff] %v82_v27  ;;  %v123_v28 = vsel %vm121_vm2, %v82_v27, 0.0  ;;  %v91_v29 = vsel %vm90_vm3, %v82_v27, -1e+30 }
  0xfb   :  { %125 = vadd.xlane.f32.xlu2 %v123_v28  ;;  %93 = vmax.xlane.f32.xlu1 %v91_v29 }
 0x101   :  { %v85_v30 = vpop.f32.mrf.mxu1 }
 0x102   :  { %89 = vst [vmem:[#allocation5 + $0x8] sm:$0xff] %v85_v30  ;;  %v92_v31 = vsel %vm90_vm3, %v85_v30, -1e+30  ;;  %v124_v41 = vsel %vm122_vm4, %v85_v30, 0.0 }
 0x103   :  { %95 = vmax.xlane.f32.xlu1 %v92_v31  ;;  %161 = dma.vmem_to_hbm [thread:$0]  %s154_s28, 256, %s156_s5, [#allocation4], %s261_s20, %s261_s20, %s262_s21  }
 0x16e   :  { %v94_v32 = vpop.xlane.xlu1 %93  ;;  %v126_v47 = vpop.xlane.xlu2 %125 }
 0x16f   :  { %v97_v33 = vsub.f32 %v91_v29, %v94_v32 }
 0x171   :  { %v99_v34 = vmul.f32 1.442695, %v97_v33 }
 0x173   :  { %200 = vpow2.f32 %v99_v34 }
 0x176   :  { %v96_v35 = vpop.xlane.xlu1 %95 }
 0x177   :  { %v98_v36 = vsub.f32 %v92_v31, %v96_v35 }
 0x179   :  { %v201_v37 = vpop.eup %200  ;;  %v101_v38 = vmul.f32 1.442695, %v98_v36 }
 0x17a   :  { %103 = vadd.xlane.f32.xlu0 %v201_v37 }
 0x17b   :  { %202 = vpow2.f32 %v101_v38 }
 0x181   :  { %v203_v39 = vpop.eup %202 }
 0x182   :  { %105 = vadd.xlane.f32.xlu1 %v203_v39 }
 0x18a   :  { %127 = vadd.xlane.f32.xlu1 %v124_v41 }
 0x1ed   :  { %v104_v42 = vpop.xlane.xlu0 %103 }
 0x1ee   :  { %204 = vlog2.f32 %v104_v42 }
 0x1f4   :  { %v205_v43 = vpop.eup %204 }
 0x1f5   :  { %v108_v44 = vmul.f32 0.6931472, %v205_v43  ;;  %v106_v45 = vpop.xlane.xlu1 %105 }
 0x1f6   :  { %206 = vlog2.f32 %v106_v45 }
 0x1f7   :  { %v111_v46 = vadd.f32 %v108_v44, %v94_v32 }
 0x1f9   :  { %v142_v48 = vsub.f32 %v111_v46, %v126_v47 }
 0x1fb   :  { %147 = vst.msk [vmem:[%s325_s4] sm:$0xff] %vm146_vm5, %v142_v48 }
 0x1fc   :  { %v207_v49 = vpop.eup %206 }
 0x1fd   :  { %v110_v50 = vmul.f32 0.6931472, %v207_v49  ;;  %v128_v52 = vpop.xlane.xlu1 %127 }
 0x1ff   :  { %v112_v51 = vadd.f32 %v110_v50, %v96_v35 }
 0x201   :  { %v143_v53 = vsub.f32 %v112_v51, %v128_v52 }
 0x203   :  { %148 = vst.msk [vmem:[%s325_s4 + $0x8] sm:$0xff] %vm146_vm5, %v143_v53 }
 0x204   :  { %258 = dma.done.wait [#allocation4], 256  }
 0x205   :  { %259 = vsyncadd [#allocation4], 4294967040 }
 0x206   :  { %170 = vsyncpa [#allocation3], 1 }
 0x207   :  { %171 = vsyncpa [#allocation4], 1 }

</bundles_post_ra>
